<compile_context>
chip_gen: v6e
topology: v6e:2x2x1
jax: 0.10.0
libtpu: 0.0.40
codegen_flags: <defaults>
</compile_context>

<pallas_src>
import math

import jax
import jax.numpy as jnp
from jax import lax
from jax.experimental import pallas as pl
from jax.experimental.pallas import tpu as pltpu


def waveblock_kernel(x_ref, w0_ref, b0_ref, wfg_ref, bfg_ref, wc_ref, bc_ref,
                     out_ref):
    """One batch element per grid step. All activations are (C, T): channels on
    sublanes, time on lanes."""
    T = x_ref.shape[2]
    C = wc_ref.shape[1]           # out_channels
    R = wfg_ref.shape[0]          # num dilation rates
    cdt = w0_ref.dtype            # matmul operand dtype (bf16 by default)

    x = x_ref[0]                                                   # (Cin, T)

    # convs[0]: 1x1 conv == (Cout, Cin) @ (Cin, T) on the MXU.
    h = jnp.dot(w0_ref[...], x.astype(cdt),
                preferred_element_type=jnp.float32) + b0_ref[...]  # (C, T) f32
    res = h

    # Lane-index iota for the roll masks, hoisted out of the rate loop
    # (broadcast_in_dim is not CSE'd by JAX).
    t_idx = lax.broadcasted_iota(jnp.int32, (C, T), 1)

    for i in range(R):            # static unroll; R is small
        d = 2 ** i
        # Dilated "same" conv taps via XLU lane rolls + VPU masks:
        #   h_m[:, t] = h[:, t-d]  (0 for t <  d)
        #   h_p[:, t] = h[:, t+d]  (0 for t >= T-d)
        h_m = jnp.where(t_idx >= d,
                        pltpu.roll(h, shift=d, axis=1), 0.0).astype(cdt)
        h_p = jnp.where(t_idx < T - d,
                        pltpu.roll(h, shift=T - d, axis=1), 0.0).astype(cdt)

        # Fuse the 3 taps and the filter/gate branches into one matmul:
        # (2C, 3C) @ (3C, T) -> (2C, T) pre-activations.
        h3 = jnp.concatenate([h_m, h.astype(cdt), h_p], axis=0)   # (3C, T)
        fg = jnp.dot(wfg_ref[i], h3,
                     preferred_element_type=jnp.float32) + bfg_ref[i]

        # Gating in f32 (no bf16 VPU/EUP path on v5e).
        z = jnp.tanh(fg[:C]) * jax.nn.sigmoid(fg[C:])             # (C, T) f32

        # convs[i+1]: 1x1 conv.
        h = jnp.dot(wc_ref[i], z.astype(cdt),
                    preferred_element_type=jnp.float32) + bc_ref[i]
        res = res + h

    out_ref[0] = res.astype(out_ref.dtype)


def waveblock_pallas(x, params, *, matmul_dtype=jnp.bfloat16):
    """x: (B, Cin, T) in PyTorch NCL layout. Returns (B, Cout, T)."""
    w0, b0, wf, bf, wg, bg, wc, bc = params   # PyTorch-layout weights
    B, Cin, T = x.shape
    Cout = w0.shape[0]
    R = wf.shape[0]
    assert 2 ** (R - 1) <= T, "largest dilation must not exceed sequence length"

    # --- Pack weights for the in-kernel NCL layout (tiny, one-time work). ---
    # 1x1 convs: already (out, in).
    w0m = w0.astype(matmul_dtype)                                   # (C, Cin)
    b0m = b0.reshape(Cout, 1).astype(jnp.float32)                   # (C, 1)
    # k=3 convs (out, in, k): fuse taps along K and filter/gate along M:
    #   Wfg[i][o, k*C + c] = w[i][o, c, k]
    wf_p = jnp.transpose(wf, (0, 1, 3, 2)).reshape(R, Cout, 3 * Cout)
    wg_p = jnp.transpose(wg, (0, 1, 3, 2)).reshape(R, Cout, 3 * Cout)
    wfgm = jnp.concatenate([wf_p, wg_p], axis=1).astype(matmul_dtype)  # (R,2C,3C)
    bfgm = jnp.concatenate([bf, bg], axis=1)[..., None].astype(jnp.float32)  # (R,2C,1)
    wcm = wc.astype(matmul_dtype)                                   # (R, C, C)
    bcm = bc[..., None].astype(jnp.float32)                         # (R, C, 1)

    return pl.pallas_call(
        waveblock_kernel,
        out_shape=jax.ShapeDtypeStruct((B, Cout, T), x.dtype),
        grid_spec=pltpu.PrefetchScalarGridSpec(
            num_scalar_prefetch=0,
            grid=(B,),
            in_specs=[
                pl.BlockSpec((1, Cin, T), lambda b: (b, 0, 0)),
                pl.BlockSpec((Cout, Cin), lambda b: (0, 0)),
                pl.BlockSpec((Cout, 1), lambda b: (0, 0)),
                pl.BlockSpec((R, 2 * Cout, 3 * Cout), lambda b: (0, 0, 0)),
                pl.BlockSpec((R, 2 * Cout, 1), lambda b: (0, 0, 0)),
                pl.BlockSpec((R, Cout, Cout), lambda b: (0, 0, 0)),
                pl.BlockSpec((R, Cout, 1), lambda b: (0, 0, 0)),
            ],
            out_specs=pl.BlockSpec((1, Cout, T), lambda b: (b, 0, 0)),
        ),
        compiler_params=pltpu.CompilerParams(
            dimension_semantics=("parallel",),      # batch sharded on v7x megacore
            vmem_limit_bytes=48 * 1024 * 1024,
        ),
    )(x, w0m, b0m, wfgm, bfgm, wcm, bcm)


def init_params(key, in_channels, out_channels, num_rates):
    """PyTorch-layout Conv1d params with U(-1/sqrt(fan_in), 1/sqrt(fan_in)) init.
      1x1 conv : weight (out, in),            bias (out,)
      k=3 conv : weight (R, out, in, 3),      bias (R, out)
    """
    ks = jax.random.split(key, 8)

    def u(k, shape, fan_in):
        bound = 1.0 / math.sqrt(fan_in)
        return jax.random.uniform(k, shape, jnp.float32, -bound, bound)

    C = out_channels
    w0 = u(ks[0], (C, in_channels), in_channels)
    b0 = u(ks[1], (C,), in_channels)
    wf = u(ks[2], (num_rates, C, C, 3), 3 * C)
    bf = u(ks[3], (num_rates, C), 3 * C)
    wg = u(ks[4], (num_rates, C, C, 3), 3 * C)
    bg = u(ks[5], (num_rates, C), 3 * C)
    wc = u(ks[6], (num_rates, C, C), C)
    bc = u(ks[7], (num_rates, C), C)
    return w0, b0, wf, bf, wg, bg, wc, bc


def waveblock_ref(x, params):
    """Pure-JAX reference of the PyTorch forward (NCL layout)."""
    w0, b0, wf, bf, wg, bg, wc, bc = params
    T = x.shape[-1]
    h = jnp.einsum("oc,bct->bot", w0, x) + b0[None, :, None]
    res = h
    for i in range(wf.shape[0]):
        d = 2 ** i
        h_m = jnp.pad(h, ((0, 0), (0, 0), (d, 0)))[..., :T]   # h[.., t-d]
        h_p = jnp.pad(h, ((0, 0), (0, 0), (0, d)))[..., d:]   # h[.., t+d]

        def dconv(w, b):
            return (jnp.einsum("oc,bct->bot", w[i, :, :, 0], h_m)
                    + jnp.einsum("oc,bct->bot", w[i, :, :, 1], h)
                    + jnp.einsum("oc,bct->bot", w[i, :, :, 2], h_p)
                    + b[i][None, :, None])

        z = jnp.tanh(dconv(wf, bf)) * jax.nn.sigmoid(dconv(wg, bg))
        h = jnp.einsum("oc,bct->bot", wc[i], z) + bc[i][None, :, None]
        res = res + h
    return res


if __name__ == "__main__":
    B, Cin, Cout, T, RATES = 2, 4, 16, 128, 3

    key = jax.random.PRNGKey(0)
    k_x, k_p = jax.random.split(key)
    x = jax.random.normal(k_x, (B, Cin, T), jnp.float32)   # NCL, like PyTorch
    params = init_params(k_p, Cin, Cout, RATES)

    ref = waveblock_ref(x, params)

    # f32-matmul path: tight check against the reference.
    out_f32 = jax.block_until_ready(
        waveblock_pallas(x, params, matmul_dtype=jnp.float32))
    assert out_f32.shape == (B, Cout, T)
    assert jnp.allclose(out_f32, ref, atol=1e-4, rtol=1e-4), "f32 kernel mismatch"

    # Default bf16-matmul path (f32 accumulation): looser tolerance.
    out_bf16 = jax.block_until_ready(waveblock_pallas(x, params))
    assert out_bf16.shape == (B, Cout, T)
    assert jnp.allclose(out_bf16, ref, atol=3e-2, rtol=3e-2), "bf16 kernel mismatch"

    print("KERNEL_OK")
</pallas_src>

<mosaic_0001>
module attributes {stable_mosaic.version = 11 : i64} {
  func.func @waveblock_kernel(%arg0: i32, %arg1: memref<1x4x128xf32, #tpu.memory_space<vmem>>, %arg2: memref<16x4xf32, #tpu.memory_space<vmem>>, %arg3: memref<16x1xf32, #tpu.memory_space<vmem>>, %arg4: memref<3x32x48xf32, #tpu.memory_space<vmem>>, %arg5: memref<3x32x1xf32, #tpu.memory_space<vmem>>, %arg6: memref<3x16x16xf32, #tpu.memory_space<vmem>>, %arg7: memref<3x16x1xf32, #tpu.memory_space<vmem>>, %arg8: memref<1x16x128xf32, #tpu.memory_space<vmem>>) attributes {dimension_semantics = [#tpu.dimension_semantics<parallel>], iteration_bounds = array<i64: 2>, scalar_prefetch = 0 : i64, scratch_operands = 0 : i64, tpu.core_type = #tpu.core_type<tc>, window_params = [{transform_indices = @transform_0, window_bounds = array<i64: 1, 4, 128>}, {pipeline_mode = #tpu.pipeline_mode<synchronous>, transform_indices = @transform_1, window_bounds = array<i64: 16, 4>}, {pipeline_mode = #tpu.pipeline_mode<synchronous>, transform_indices = @transform_2, window_bounds = array<i64: 16, 1>}, {pipeline_mode = #tpu.pipeline_mode<synchronous>, transform_indices = @transform_3, window_bounds = array<i64: 3, 32, 48>}, {pipeline_mode = #tpu.pipeline_mode<synchronous>, transform_indices = @transform_4, window_bounds = array<i64: 3, 32, 1>}, {pipeline_mode = #tpu.pipeline_mode<synchronous>, transform_indices = @transform_5, window_bounds = array<i64: 3, 16, 16>}, {pipeline_mode = #tpu.pipeline_mode<synchronous>, transform_indices = @transform_6, window_bounds = array<i64: 3, 16, 1>}, {transform_indices = @transform_7, window_bounds = array<i64: 1, 16, 128>}]} {
    %c0 = arith.constant 0 : index
    %c0_0 = arith.constant 0 : index
    %c0_1 = arith.constant 0 : index
    %0 = vector.load %arg1[%c0, %c0_0, %c0_1] : memref<1x4x128xf32, #tpu.memory_space<vmem>>, vector<1x4x128xf32>
    %1 = vector.shape_cast %0 : vector<1x4x128xf32> to vector<4x128xf32>
    %c0_2 = arith.constant 0 : index
    %c0_3 = arith.constant 0 : index
    %2 = vector.load %arg2[%c0_2, %c0_3] : memref<16x4xf32, #tpu.memory_space<vmem>>, vector<16x4xf32>
    %cst = arith.constant dense<0.000000e+00> : vector<16x128xf32>
    %3 = tpu.matmul %2, %1, %cst {dimension_numbers = #tpu.dot_dimension_numbers<[1], [0], [0], [1], [0, 0, 1, 1], [], []>} : vector<16x4xf32>, vector<4x128xf32>, vector<16x128xf32> -> vector<16x128xf32>
    %c0_4 = arith.constant 0 : index
    %c0_5 = arith.constant 0 : index
    %4 = vector.load %arg3[%c0_4, %c0_5] : memref<16x1xf32, #tpu.memory_space<vmem>>, vector<16x1xf32>
    %5 = vector.broadcast %4 : vector<16x1xf32> to vector<16x128xf32>
    %6 = arith.addf %3, %5 : vector<16x128xf32>
    %7 = tpu.iota {dimensions = array<i32: 1>} : vector<16x128xi32>
    %c1_i32 = arith.constant 1 : i32
    %8 = vector.broadcast %c1_i32 : i32 to vector<16x128xi32>
    %9 = arith.cmpi sge, %7, %8 : vector<16x128xi32>
    %c1_i32_6 = arith.constant 1 : i32
    %10 = tpu.dynamic_rotate %6 by %c1_i32_6 dim 1 : vector<16x128xf32>, i32 -> vector<16x128xf32>
    %cst_7 = arith.constant 0.000000e+00 : f32
    %11 = vector.broadcast %cst_7 : f32 to vector<16x128xf32>
    %12 = arith.select %9, %10, %11 : vector<16x128xi1>, vector<16x128xf32>
    %c127_i32 = arith.constant 127 : i32
    %13 = vector.broadcast %c127_i32 : i32 to vector<16x128xi32>
    %14 = arith.cmpi slt, %7, %13 : vector<16x128xi32>
    %c127_i32_8 = arith.constant 127 : i32
    %15 = tpu.dynamic_rotate %6 by %c127_i32_8 dim 1 : vector<16x128xf32>, i32 -> vector<16x128xf32>
    %cst_9 = arith.constant 0.000000e+00 : f32
    %16 = vector.broadcast %cst_9 : f32 to vector<16x128xf32>
    %17 = arith.select %14, %15, %16 : vector<16x128xi1>, vector<16x128xf32>
    %18 = tpu.concatenate %12, %6, %17 in 0 : vector<16x128xf32>, vector<16x128xf32>, vector<16x128xf32> -> vector<48x128xf32>
    %c0_10 = arith.constant 0 : index
    %c0_11 = arith.constant 0 : index
    %c0_12 = arith.constant 0 : index
    %19 = vector.load %arg4[%c0_10, %c0_11, %c0_12] : memref<3x32x48xf32, #tpu.memory_space<vmem>>, vector<1x32x48xf32>
    %20 = vector.shape_cast %19 : vector<1x32x48xf32> to vector<32x48xf32>
    %cst_13 = arith.constant dense<0.000000e+00> : vector<32x128xf32>
    %21 = tpu.matmul %20, %18, %cst_13 {dimension_numbers = #tpu.dot_dimension_numbers<[1], [0], [0], [1], [0, 0, 1, 1], [], []>} : vector<32x48xf32>, vector<48x128xf32>, vector<32x128xf32> -> vector<32x128xf32>
    %c0_14 = arith.constant 0 : index
    %c0_15 = arith.constant 0 : index
    %c0_16 = arith.constant 0 : index
    %22 = vector.load %arg5[%c0_14, %c0_15, %c0_16] : memref<3x32x1xf32, #tpu.memory_space<vmem>>, vector<1x32x1xf32>
    %23 = vector.shape_cast %22 : vector<1x32x1xf32> to vector<32x1xf32>
    %24 = vector.broadcast %23 : vector<32x1xf32> to vector<32x128xf32>
    %25 = arith.addf %21, %24 : vector<32x128xf32>
    %26 = vector.extract_strided_slice %25 {offsets = [0, 0], sizes = [16, 128], strides = [1, 1]} : vector<32x128xf32> to vector<16x128xf32>
    %27 = math.tanh %26 : vector<16x128xf32>
    %28 = vector.extract_strided_slice %25 {offsets = [16, 0], sizes = [16, 128], strides = [1, 1]} : vector<32x128xf32> to vector<16x128xf32>
    %29 = arith.negf %28 : vector<16x128xf32>
    %30 = math.exp %29 : vector<16x128xf32>
    %cst_17 = arith.constant 1.000000e+00 : f32
    %31 = vector.broadcast %cst_17 : f32 to vector<16x128xf32>
    %32 = arith.addf %31, %30 : vector<16x128xf32>
    %33 = arith.divf %31, %32 : vector<16x128xf32>
    %34 = arith.mulf %27, %33 : vector<16x128xf32>
    %c0_18 = arith.constant 0 : index
    %c0_19 = arith.constant 0 : index
    %c0_20 = arith.constant 0 : index
    %35 = vector.load %arg6[%c0_18, %c0_19, %c0_20] : memref<3x16x16xf32, #tpu.memory_space<vmem>>, vector<1x16x16xf32>
    %36 = vector.shape_cast %35 : vector<1x16x16xf32> to vector<16x16xf32>
    %cst_21 = arith.constant dense<0.000000e+00> : vector<16x128xf32>
    %37 = tpu.matmul %36, %34, %cst_21 {dimension_numbers = #tpu.dot_dimension_numbers<[1], [0], [0], [1], [0, 0, 1, 1], [], []>} : vector<16x16xf32>, vector<16x128xf32>, vector<16x128xf32> -> vector<16x128xf32>
    %c0_22 = arith.constant 0 : index
    %c0_23 = arith.constant 0 : index
    %c0_24 = arith.constant 0 : index
    %38 = vector.load %arg7[%c0_22, %c0_23, %c0_24] : memref<3x16x1xf32, #tpu.memory_space<vmem>>, vector<1x16x1xf32>
    %39 = vector.shape_cast %38 : vector<1x16x1xf32> to vector<16x1xf32>
    %40 = vector.broadcast %39 : vector<16x1xf32> to vector<16x128xf32>
    %41 = arith.addf %37, %40 : vector<16x128xf32>
    %42 = arith.addf %6, %41 : vector<16x128xf32>
    %c2_i32 = arith.constant 2 : i32
    %43 = vector.broadcast %c2_i32 : i32 to vector<16x128xi32>
    %44 = arith.cmpi sge, %7, %43 : vector<16x128xi32>
    %c2_i32_25 = arith.constant 2 : i32
    %45 = tpu.dynamic_rotate %41 by %c2_i32_25 dim 1 : vector<16x128xf32>, i32 -> vector<16x128xf32>
    %cst_26 = arith.constant 0.000000e+00 : f32
    %46 = vector.broadcast %cst_26 : f32 to vector<16x128xf32>
    %47 = arith.select %44, %45, %46 : vector<16x128xi1>, vector<16x128xf32>
    %c126_i32 = arith.constant 126 : i32
    %48 = vector.broadcast %c126_i32 : i32 to vector<16x128xi32>
    %49 = arith.cmpi slt, %7, %48 : vector<16x128xi32>
    %c126_i32_27 = arith.constant 126 : i32
    %50 = tpu.dynamic_rotate %41 by %c126_i32_27 dim 1 : vector<16x128xf32>, i32 -> vector<16x128xf32>
    %cst_28 = arith.constant 0.000000e+00 : f32
    %51 = vector.broadcast %cst_28 : f32 to vector<16x128xf32>
    %52 = arith.select %49, %50, %51 : vector<16x128xi1>, vector<16x128xf32>
    %53 = tpu.concatenate %47, %41, %52 in 0 : vector<16x128xf32>, vector<16x128xf32>, vector<16x128xf32> -> vector<48x128xf32>
    %c1 = arith.constant 1 : index
    %c0_29 = arith.constant 0 : index
    %c0_30 = arith.constant 0 : index
    %54 = vector.load %arg4[%c1, %c0_29, %c0_30] : memref<3x32x48xf32, #tpu.memory_space<vmem>>, vector<1x32x48xf32>
    %55 = vector.shape_cast %54 : vector<1x32x48xf32> to vector<32x48xf32>
    %cst_31 = arith.constant dense<0.000000e+00> : vector<32x128xf32>
    %56 = tpu.matmul %55, %53, %cst_31 {dimension_numbers = #tpu.dot_dimension_numbers<[1], [0], [0], [1], [0, 0, 1, 1], [], []>} : vector<32x48xf32>, vector<48x128xf32>, vector<32x128xf32> -> vector<32x128xf32>
    %c1_32 = arith.constant 1 : index
    %c0_33 = arith.constant 0 : index
    %c0_34 = arith.constant 0 : index
    %57 = vector.load %arg5[%c1_32, %c0_33, %c0_34] : memref<3x32x1xf32, #tpu.memory_space<vmem>>, vector<1x32x1xf32>
    %58 = vector.shape_cast %57 : vector<1x32x1xf32> to vector<32x1xf32>
    %59 = vector.broadcast %58 : vector<32x1xf32> to vector<32x128xf32>
    %60 = arith.addf %56, %59 : vector<32x128xf32>
    %61 = vector.extract_strided_slice %60 {offsets = [0, 0], sizes = [16, 128], strides = [1, 1]} : vector<32x128xf32> to vector<16x128xf32>
    %62 = math.tanh %61 : vector<16x128xf32>
    %63 = vector.extract_strided_slice %60 {offsets = [16, 0], sizes = [16, 128], strides = [1, 1]} : vector<32x128xf32> to vector<16x128xf32>
    %64 = arith.negf %63 : vector<16x128xf32>
    %65 = math.exp %64 : vector<16x128xf32>
    %cst_35 = arith.constant 1.000000e+00 : f32
    %66 = vector.broadcast %cst_35 : f32 to vector<16x128xf32>
    %67 = arith.addf %66, %65 : vector<16x128xf32>
    %68 = arith.divf %66, %67 : vector<16x128xf32>
    %69 = arith.mulf %62, %68 : vector<16x128xf32>
    %c1_36 = arith.constant 1 : index
    %c0_37 = arith.constant 0 : index
    %c0_38 = arith.constant 0 : index
    %70 = vector.load %arg6[%c1_36, %c0_37, %c0_38] : memref<3x16x16xf32, #tpu.memory_space<vmem>>, vector<1x16x16xf32>
    %71 = vector.shape_cast %70 : vector<1x16x16xf32> to vector<16x16xf32>
    %cst_39 = arith.constant dense<0.000000e+00> : vector<16x128xf32>
    %72 = tpu.matmul %71, %69, %cst_39 {dimension_numbers = #tpu.dot_dimension_numbers<[1], [0], [0], [1], [0, 0, 1, 1], [], []>} : vector<16x16xf32>, vector<16x128xf32>, vector<16x128xf32> -> vector<16x128xf32>
    %c1_40 = arith.constant 1 : index
    %c0_41 = arith.constant 0 : index
    %c0_42 = arith.constant 0 : index
    %73 = vector.load %arg7[%c1_40, %c0_41, %c0_42] : memref<3x16x1xf32, #tpu.memory_space<vmem>>, vector<1x16x1xf32>
    %74 = vector.shape_cast %73 : vector<1x16x1xf32> to vector<16x1xf32>
    %75 = vector.broadcast %74 : vector<16x1xf32> to vector<16x128xf32>
    %76 = arith.addf %72, %75 : vector<16x128xf32>
    %77 = arith.addf %42, %76 : vector<16x128xf32>
    %c4_i32 = arith.constant 4 : i32
    %78 = vector.broadcast %c4_i32 : i32 to vector<16x128xi32>
    %79 = arith.cmpi sge, %7, %78 : vector<16x128xi32>
    %c4_i32_43 = arith.constant 4 : i32
    %80 = tpu.dynamic_rotate %76 by %c4_i32_43 dim 1 : vector<16x128xf32>, i32 -> vector<16x128xf32>
    %cst_44 = arith.constant 0.000000e+00 : f32
    %81 = vector.broadcast %cst_44 : f32 to vector<16x128xf32>
    %82 = arith.select %79, %80, %81 : vector<16x128xi1>, vector<16x128xf32>
    %c124_i32 = arith.constant 124 : i32
    %83 = vector.broadcast %c124_i32 : i32 to vector<16x128xi32>
    %84 = arith.cmpi slt, %7, %83 : vector<16x128xi32>
    %c124_i32_45 = arith.constant 124 : i32
    %85 = tpu.dynamic_rotate %76 by %c124_i32_45 dim 1 : vector<16x128xf32>, i32 -> vector<16x128xf32>
    %cst_46 = arith.constant 0.000000e+00 : f32
    %86 = vector.broadcast %cst_46 : f32 to vector<16x128xf32>
    %87 = arith.select %84, %85, %86 : vector<16x128xi1>, vector<16x128xf32>
    %88 = tpu.concatenate %82, %76, %87 in 0 : vector<16x128xf32>, vector<16x128xf32>, vector<16x128xf32> -> vector<48x128xf32>
    %c2 = arith.constant 2 : index
    %c0_47 = arith.constant 0 : index
    %c0_48 = arith.constant 0 : index
    %89 = vector.load %arg4[%c2, %c0_47, %c0_48] : memref<3x32x48xf32, #tpu.memory_space<vmem>>, vector<1x32x48xf32>
    %90 = vector.shape_cast %89 : vector<1x32x48xf32> to vector<32x48xf32>
    %cst_49 = arith.constant dense<0.000000e+00> : vector<32x128xf32>
    %91 = tpu.matmul %90, %88, %cst_49 {dimension_numbers = #tpu.dot_dimension_numbers<[1], [0], [0], [1], [0, 0, 1, 1], [], []>} : vector<32x48xf32>, vector<48x128xf32>, vector<32x128xf32> -> vector<32x128xf32>
    %c2_50 = arith.constant 2 : index
    %c0_51 = arith.constant 0 : index
    %c0_52 = arith.constant 0 : index
    %92 = vector.load %arg5[%c2_50, %c0_51, %c0_52] : memref<3x32x1xf32, #tpu.memory_space<vmem>>, vector<1x32x1xf32>
    %93 = vector.shape_cast %92 : vector<1x32x1xf32> to vector<32x1xf32>
    %94 = vector.broadcast %93 : vector<32x1xf32> to vector<32x128xf32>
    %95 = arith.addf %91, %94 : vector<32x128xf32>
    %96 = vector.extract_strided_slice %95 {offsets = [0, 0], sizes = [16, 128], strides = [1, 1]} : vector<32x128xf32> to vector<16x128xf32>
    %97 = math.tanh %96 : vector<16x128xf32>
    %98 = vector.extract_strided_slice %95 {offsets = [16, 0], sizes = [16, 128], strides = [1, 1]} : vector<32x128xf32> to vector<16x128xf32>
    %99 = arith.negf %98 : vector<16x128xf32>
    %100 = math.exp %99 : vector<16x128xf32>
    %cst_53 = arith.constant 1.000000e+00 : f32
    %101 = vector.broadcast %cst_53 : f32 to vector<16x128xf32>
    %102 = arith.addf %101, %100 : vector<16x128xf32>
    %103 = arith.divf %101, %102 : vector<16x128xf32>
    %104 = arith.mulf %97, %103 : vector<16x128xf32>
    %c2_54 = arith.constant 2 : index
    %c0_55 = arith.constant 0 : index
    %c0_56 = arith.constant 0 : index
    %105 = vector.load %arg6[%c2_54, %c0_55, %c0_56] : memref<3x16x16xf32, #tpu.memory_space<vmem>>, vector<1x16x16xf32>
    %106 = vector.shape_cast %105 : vector<1x16x16xf32> to vector<16x16xf32>
    %cst_57 = arith.constant dense<0.000000e+00> : vector<16x128xf32>
    %107 = tpu.matmul %106, %104, %cst_57 {dimension_numbers = #tpu.dot_dimension_numbers<[1], [0], [0], [1], [0, 0, 1, 1], [], []>} : vector<16x16xf32>, vector<16x128xf32>, vector<16x128xf32> -> vector<16x128xf32>
    %c2_58 = arith.constant 2 : index
    %c0_59 = arith.constant 0 : index
    %c0_60 = arith.constant 0 : index
    %108 = vector.load %arg7[%c2_58, %c0_59, %c0_60] : memref<3x16x1xf32, #tpu.memory_space<vmem>>, vector<1x16x1xf32>
    %109 = vector.shape_cast %108 : vector<1x16x1xf32> to vector<16x1xf32>
    %110 = vector.broadcast %109 : vector<16x1xf32> to vector<16x128xf32>
    %111 = arith.addf %107, %110 : vector<16x128xf32>
    %112 = arith.addf %77, %111 : vector<16x128xf32>
    %c0_61 = arith.constant 0 : index
    %c0_62 = arith.constant 0 : index
    %c0_63 = arith.constant 0 : index
    %113 = vector.load %arg8[%c0_61, %c0_62, %c0_63] : memref<1x16x128xf32, #tpu.memory_space<vmem>>, vector<1x16x128xf32>
    %114 = vector.shape_cast %113 : vector<1x16x128xf32> to vector<16x128xf32>
    %115 = vector.shape_cast %112 : vector<16x128xf32> to vector<1x16x128xf32>
    tpu.vector_store %arg8[%c0_61, %c0_62, %c0_63], %115 {strides = array<i32>} : memref<1x16x128xf32, #tpu.memory_space<vmem>>, vector<1x16x128xf32>,
    return
  }
  func.func @transform_0(%arg0: i32) -> (i32, i32, i32) {
    %c0_i32 = arith.constant 0 : i32
    %c0_i32_0 = arith.constant 0 : i32
    %c0_i32_1 = arith.constant 0 : i32
    return %arg0, %c0_i32, %c0_i32_0 : i32, i32, i32
  }
  func.func @transform_1(%arg0: i32) -> (i32, i32) {
    %c0_i32 = arith.constant 0 : i32
    %c0_i32_0 = arith.constant 0 : i32
    %c0_i32_1 = arith.constant 0 : i32
    return %c0_i32, %c0_i32_0 : i32, i32
  }
  func.func @transform_2(%arg0: i32) -> (i32, i32) {
    %c0_i32 = arith.constant 0 : i32
    %c0_i32_0 = arith.constant 0 : i32
    %c0_i32_1 = arith.constant 0 : i32
    return %c0_i32, %c0_i32_0 : i32, i32
  }
  func.func @transform_3(%arg0: i32) -> (i32, i32, i32) {
    %c0_i32 = arith.constant 0 : i32
    %c0_i32_0 = arith.constant 0 : i32
    %c0_i32_1 = arith.constant 0 : i32
    %c0_i32_2 = arith.constant 0 : i32
    return %c0_i32, %c0_i32_0, %c0_i32_1 : i32, i32, i32
  }
  func.func @transform_4(%arg0: i32) -> (i32, i32, i32) {
    %c0_i32 = arith.constant 0 : i32
    %c0_i32_0 = arith.constant 0 : i32
    %c0_i32_1 = arith.constant 0 : i32
    %c0_i32_2 = arith.constant 0 : i32
    return %c0_i32, %c0_i32_0, %c0_i32_1 : i32, i32, i32
  }
  func.func @transform_5(%arg0: i32) -> (i32, i32, i32) {
    %c0_i32 = arith.constant 0 : i32
    %c0_i32_0 = arith.constant 0 : i32
    %c0_i32_1 = arith.constant 0 : i32
    %c0_i32_2 = arith.constant 0 : i32
    return %c0_i32, %c0_i32_0, %c0_i32_1 : i32, i32, i32
  }
  func.func @transform_6(%arg0: i32) -> (i32, i32, i32) {
    %c0_i32 = arith.constant 0 : i32
    %c0_i32_0 = arith.constant 0 : i32
    %c0_i32_1 = arith.constant 0 : i32
    %c0_i32_2 = arith.constant 0 : i32
    return %c0_i32, %c0_i32_0, %c0_i32_1 : i32, i32, i32
  }
  func.func @transform_7(%arg0: i32) -> (i32, i32, i32) {
    %c0_i32 = arith.constant 0 : i32
    %c0_i32_0 = arith.constant 0 : i32
    %c0_i32_1 = arith.constant 0 : i32
    return %arg0, %c0_i32, %c0_i32_0 : i32, i32, i32
  }
}

</mosaic_0001>

<bundles_post_ra>
// kernel: tpu_custom_call.1
= control target key start
LH: loop header
LB: loop body
LE: loop exit
PB: predicated region body
PF: predicated region fallthrough
CT: control target
= control target key end

     0   :  { %12 = vsyncpa [#allocation3], 0  ;;  %s1911_s0 = inlined_call_operand.vmem [shape: f32[2,4,128], index: 0, kind: input, shape index: {}]   ;;  %s1912_s1 = inlined_call_operand.vmem [shape: f32[16,4], index: 1, kind: input, shape index: {}]   ;;  %s1913_s2 = inlined_call_operand.vmem [shape: f32[16,1], index: 2, kind: input, shape index: {}]   ;;  %s1914_s3 = inlined_call_operand.vmem [shape: f32[3,32,48], index: 3, kind: input, shape index: {}]   ;;  %s1915_s4 = inlined_call_operand.vmem [shape: f32[3,32,1], index: 4, kind: input, shape index: {}]   ;;  %s1916_s5 = inlined_call_operand.vmem [shape: f32[3,16,16], index: 5, kind: input, shape index: {}]   ;;  %s1917_s6 = inlined_call_operand.vmem [shape: f32[3,16,1], index: 6, kind: input, shape index: {}]   ;;  %s1918_s7 = inlined_call_operand.hbm [shape: f32[2,16,128], index: 7, kind: output, shape index: {}]  }
   0x1   :  { %14 = vsyncpa [#allocation3 + $0x1], 0  ;;  %s1619_s24 = smov 0   ;;  %s1621_s25 = smov 0  }
   0x2   :  { %s1623_s26 = smov 0   ;;  %s1625_s27 = smov 0  }
   0x3 LB: > { %s1640_s28 = sadd.s32 4294967295, %s1567_s27   ;;  %s1221_s29 = sadd.s32 4294967294, %s1567_s27   ;;  %s1567_s27 = sphi %s1625_s27, %s1924_s27   ;;  %s1563_s26 = sphi %s1623_s26, %s1923_s26   ;;  %s1559_s25 = sphi %s1621_s25, %s1922_s25   ;;  %s1555_s24 = sphi %s1619_s24, %s1921_s24  }
   0x4   : > { %s1644_s30 = sadd.s32 1, %s1567_s27   ;;  %s179_s8 = sadd.s32 1, %s1563_s26 }
   0x5   : > { %s176_s9 = ssub.s32 %s1567_s27, %s1644_s30  ;;  %p189_p0 = scmp.ne.s32.totalorder %s1563_s26, %s1559_s25 }
   0x6   : > { %p177_p1 = scmp.eq.s32.totalorder %s176_s9, 0  ;;  %p190_p2 = scmp.eq.s32.totalorder %s1640_s28, 1 }
   0x7   : > { %p195_p3 = scmp.ne.s32.totalorder %s1559_s25, %s1555_s24  ;;  %p196_p4 = scmp.eq.s32.totalorder %s1221_s29, 1 }
   0x8   : > { %s1655_s10 = scalar_select %p177_p1, %s1563_s26, %s179_s8  }
   0x9   : > { %p1657_p5 = por %p190_p2, %p189_p0  ;;  %p1661_p6 = por %p196_p4, %p195_p3 }
   0xa   : > { %p1224_p7 = scmp.ge.s32.totalorder %s1567_s27, 1  ;;  %p239_p8 = scmp.lt.s32.totalorder %s1567_s27, 3 }
   0xc   : > { %p240_p9 = pnand %p1224_p7, %p239_p8 }
   0xd   : > { %p270_p10 = scmp.lt.s32.totalorder (!%p240_p9), %s1640_s28, 1  ;;  %s1570_s14 = smov (!%p240_p9), 1  }
   0xe   : > { %243 = sbr.rel (%p240_p9) target bundleno = 1918 (0x77e), region = 48  ;;  %s1571_s15 = smov (!%p240_p9), 127  }
   0xf   : > { %s1572_s9 = smov (!%p240_p9), 126   ;;  %s1573_s13 = smov (!%p240_p9), 2  }
  0x10   : > { %s1574_s29 = smov (!%p240_p9), 124   ;;  %s1575_s8 = smov (!%p240_p9), 4  }
  0x13   : > { %v275_v0 = vld [vmem:[%s1912_s1] sm:$0xff]  ;;  %vm289_vm0 = vcmask 31744   ;;  %v1569_v1 = vmov 0   ;;  %v278_v2 = vld [vmem:[%s1913_s2 + $0x8] sm:$0xff]  ;;  %s271_s17 = scalar_select %p270_p10, %s1640_s28, 1  ;;  %vm296_vm1 = vcmask 1043456   ;;  %v375_v19 = vlaneseq }
  0x14   : > { %1343 = vmatprep.mubr.msk.f32.mxu0 %vm289_vm0, %v275_v0  ;;  %1469 = vset.pattern.permute.xlu0 %v1569_v1  ;;  %v277_v3 = vld [vmem:[%s1913_s2] sm:$0xff]  ;;  %v276_v5 = vld [vmem:[%s1912_s1 + $0x8] sm:$0xff]  ;;  %vm419_vm2 = vcmask 392192   ;;  %v398_v12 = vld [vmem:[%s1915_s4 + $0x18] sm:$0xff]  ;;  %vm547_vm5 = vcmask 130048  }
  0x15   : > { %286 = vperm.xlu0 %1469, %v278_v2   ;;  %1470 = vset.pattern.permute.xlu1 %v1569_v1  ;;  %s1226_s20 = sshll.u32 %s271_s17, 2  ;;  %v391_v10 = vld [vmem:[%s1914_s3] sm:$0xff]  ;;  %v396_v14 = vld [vmem:[%s1915_s4 + $0x8] sm:$0xff]  ;;  %v397_v16 = vld [vmem:[%s1915_s4 + $0x10] sm:$0xff]  ;;  %v1716_v20 = vand.u32 127, %v375_v19 }
  0x16   : > { %s273_s23 = scalar_lea.vmem %s1911_s0, %s1226_s20  ;;  %1358 = vmatprep.mubr.msk.f32.mxu1 %vm419_vm2, %v391_v10  ;;  %v536_v15 = vld [vmem:[%s1917_s6 + $0x8] sm:$0xff]  ;;  %v395_v17 = vld [vmem:[%s1915_s4] sm:$0xff]  ;;  %v393_v26 = vld [vmem:[%s1914_s3 + $0x10] sm:$0xff]  ;;  %s267_s20 = sand.u32 1, %s1559_s25  }
  0x17   : > { %v274_v4 = vld [vmem:[%s273_s23] sm:$0xf]  ;;  %vm384_vm3 = vcmp.lt.s32.totalorder %v1716_v20, 127  ;;  %vm377_vm4 = vcmp.ge.s32.totalorder %v1716_v20, 1  ;;  %v392_v25 = vld [vmem:[%s1914_s3 + $0x8] sm:$0xff]  ;;  %v394_v27 = vld [vmem:[%s1914_s3 + $0x18] sm:$0xff] }
  0x18   : > { %1341 = vmatprep.subr.msk.mxu0 %vm296_vm1, %v274_v4  ;;  %v535_v18 = vld [vmem:[%s1917_s6] sm:$0xff]  ;;  %v534_v53 = vld [vmem:[%s1916_s5 + $0x8] sm:$0xff]  ;;  %v1249_v61 = vld [vmem:[%s1915_s4 + $0x38] sm:$0xff]  ;;  %vm638_vm6 = vcmp.lt.s32.totalorder %v1716_v20, 126  ;;  %vm631_vm7 = vcmp.ge.s32.totalorder %v1716_v20, 2  ;;  %vm894_vm8 = vcmp.lt.s32.totalorder %v1716_v20, 124 }
  0x19   : > { %281 = vperm.xlu0 %1469, %v277_v3   ;;  %1342 = vmatpush3.msk.msra.mxu0 %vm296_vm1, %v274_v4  ;;  %v533_v28 = vld [vmem:[%s1916_s5] sm:$0xff]  ;;  %v1248_v62 = vld [vmem:[%s1915_s4 + $0x30] sm:$0xff]  ;;  %v1247_v63 = vld [vmem:[%s1915_s4 + $0x28] sm:$0xff]  ;;  %vm887_vm9 = vcmp.ge.s32.totalorder %v1716_v20, 4  ;;  %s1225_s21 = sshll.u32 %s267_s20, 4 }
  0x1a   : > { %1344 = vmatmul.mubr.msk.f32.vlgmr.msra.gmra.mxu0 %vm289_vm0, %v276_v5  ;;  %v1242_v56 = vld [vmem:[%s1914_s3 + $0x20] sm:$0xff]  ;;  %v1263_v1 = vld [vmem:[%s1917_s6 + $0x18] sm:$0xff]  ;;  %v1262_v2 = vld [vmem:[%s1917_s6 + $0x10] sm:$0xff]  ;;  %s269_s22 = scalar_lea.vmem [#allocation2], %s1225_s21 }
  0x1b   : > { %1383 = vmatprep.mubr.msk.f32.mxu0 %vm419_vm2, %v1242_v56  ;;  %v1246_v0 = vld [vmem:[%s1915_s4 + $0x20] sm:$0xff]  ;;  %v1245_v10 = vld [vmem:[%s1914_s3 + $0x38] sm:$0xff]  ;;  %v1267_v56 = vld [vmem:[%s1914_s3 + $0x48] sm:$0xff]  ;;  %s1159_s23 = sshll.u32 %s269_s22, 4  ;;  %s1864_s23 = int_to_ptr.vmem [resolvable:$true] %s1159_s23 }
  0x1c   : > { %v1269_v20 = vld [vmem:[%s1914_s3 + $0x58] sm:$0xff] }
  0x90   : > { %v287_v6 = vpop.permute.xlu0 %286 }
  0x94   : > { %v282_v11 = vpop.permute.xlu0 %281 }
  0xda   : > { %v1345_v7 = vpop.f32.mrf.mxu0 }
  0xdb   : > { %v1686_v8 = vadd.f32 %v1345_v7, %v287_v6  ;;  %v1243_v7 = vld [vmem:[%s1914_s3 + $0x28] sm:$0xff] }
  0xdc   : > { %v366_v9 = vpop.f32.mrf.mxu0 }
  0xdd   : > { %380 = vrot.lane.b32.xlu0 %v1686_v8, %s1570_s14  ;;  %387 = vrot.lane.b32.xlu1 %v1686_v8, %s1571_s15  ;;  %v1697_v13 = vadd.f32 %v366_v9, %v282_v11  ;;  %v1244_v9 = vld [vmem:[%s1914_s3 + $0x30] sm:$0xff] }
  0xde   : > { %v1260_v11 = vld [vmem:[%s1916_s5 + $0x10] sm:$0xff] }
  0xe1   : > { %416 = vperm.xlu0 %1469, %v398_v12   ;;  %385 = vrot.lane.b32.xlu1 %v1697_v13, %s1571_s15  ;;  %s1576_s15 = smov [#allocation2]  }
  0xe2   : > { %s1511_s16 = sshll.u32 %s1576_s15, 4  ;;  %s1512_s16 = int_to_ptr.vmem [resolvable:$false] %s1511_s16 }
  0xe3   : > { %s1513_s17 = scalar_lea.vmem %s1512_s16, 512  ;;  %p1514_p0 = scmp.lt.s32.totalorder %s1864_s23, %s1512_s16 }
  0xe5   : > { %406 = vperm.xlu0 %1469, %v396_v14   ;;  %378 = vrot.lane.b32.xlu1 %v1697_v13, %s1570_s14  ;;  %s1507_s14 = scalar_lea.vmem %s1864_s23, 256 }
  0xe6   : > { %p1508_p11 = scmp.ne.s32.totalorder %s1864_s23, %s1507_s14  ;;  %p1515_p1 = scmp.lt.s32.totalorder %s1513_s17, %s1507_s14 }
  0xe8   : > { %p1509_p12 = pnand %p1508_p11, %p1657_p5  ;;  %p1516_p2 = por %p1515_p1, %p1514_p0 }
  0xe9   : > { %544 = vperm.xlu0 %1469, %v536_v15   ;;  %411 = vperm.xlu1 %1470, %v397_v16  }
  0xea   : > { %p1510_p13 = pneg %p1509_p12 }
  0xec   : > { %p1517_p3 = pnand %p1516_p2, %p1510_p13 }
  0xed   : > { %401 = vperm.xlu1 %1470, %v395_v17  }
  0xf1   : > { %539 = vperm.xlu1 %1470, %v535_v18  }
 0x14f   : > { %v388_v21 = vpop.permute.xlu1 %387  ;;  %v381_v23 = vpop.permute.xlu0 %380 }
 0x150   : > { %1346 = vmatprep.subr.msk.mxu1 %vm384_vm3, %v388_v21 }
 0x151   : > { %1347 = vmatpush3.msk.msra.mxu1 %vm384_vm3, %v388_v21 }
 0x153   : > { %v386_v22 = vpop.permute.xlu1 %385 }
 0x154   : > { %1348 = vmatprep.subr.msk.mxu1 %vm384_vm3, %v386_v22 }
 0x155   : > { %1349 = vmatpush3.msk.msra.mxu1 %vm384_vm3, %v386_v22 }
 0x156   : > { %1350 = vmatprep.subr.mxu1 %v1686_v8 }
 0x157   : > { %1351 = vmatpush3.msra.mxu1 %v1686_v8  ;;  %v379_v24 = vpop.permute.xlu1 %378 }
 0x158   : > { %1352 = vmatprep.subr.mxu1 %v1697_v13 }
 0x159   : > { %1353 = vmatpush3.msra.mxu1 %v1697_v13 }
 0x15a   : > { %1354 = vmatprep.subr.msk.mxu1 %vm377_vm4, %v381_v23 }
 0x15b   : > { %1355 = vmatpush3.msk.msra.mxu1 %vm377_vm4, %v381_v23 }
 0x15c   : > { %1356 = vmatprep.subr.msk.mxu1 %vm377_vm4, %v379_v24  ;;  %v417_v31 = vpop.permute.xlu0 %416 }
 0x15d   : > { %1357 = vmatpush3.msk.msra.mxu1 %vm377_vm4, %v379_v24 }
 0x15e   : > { %1359 = vmatmul.mubr.msk.f32.vlgmr.msra.gmra.mxu1 %vm419_vm2, %v392_v25 }
 0x15f   : > { %1361 = vmatprep.mubr.msk.f32.mxu1 %vm419_vm2, %v393_v26 }
 0x160   : > { %v407_v39 = vpop.permute.xlu0 %406 }
 0x162   : > { %1362 = vmatmul.mubr.msk.f32.gmra.mxu1 %vm419_vm2, %v394_v27 }
 0x163   : > { %1368 = vmatprep.mubr.msk.f32.mxu1 %vm547_vm5, %v533_v28 }
 0x164   : > { %v412_v34 = vpop.permute.xlu1 %411  ;;  %v545_v54 = vpop.permute.xlu0 %544 }
 0x168   : > { %v402_v40 = vpop.permute.xlu1 %401 }
 0x16c   : > { %v540_v58 = vpop.permute.xlu1 %539 }
 0x21e   : > { %v1360_v29 = vpop.f32.mrf.mxu1 }
 0x21f   : > { %v504_v41 = vadd.f32 %v1360_v29, %v407_v39 }
 0x220   : > { %v498_v30 = vpop.f32.mrf.mxu1 }
 0x221   : > { %v499_v43 = vadd.f32 %v498_v30, %v402_v40 }
 0x222   : > { %v1363_v32 = vpop.f32.mrf.mxu1 }
 0x223   : > { %v514_v33 = vadd.f32 %v1363_v32, %v417_v31 }
 0x224   : > { %v508_v35 = vpop.f32.mrf.mxu1 }
 0x225   : > { %v1239_v36 = vmul.f32 -1.442695, %v514_v33  ;;  %v509_v37 = vadd.f32 %v508_v35, %v412_v34 }
 0x227   : > { %1471 = vpow2.f32 %v1239_v36  ;;  %v1238_v38 = vmul.f32 -1.442695, %v509_v37 }
 0x229   : > { %1473 = vpow2.f32 %v1238_v38  ;;  %v1261_v38 = vld [vmem:[%s1916_s5 + $0x18] sm:$0xff] }
 0x22a   : > { %1475 = vtanh.f32 %v504_v41  ;;  %v1266_v41 = vld [vmem:[%s1914_s3 + $0x40] sm:$0xff] }
 0x234   : > { %v1472_v42 = vpop.eup %1471 }
 0x235   : > { %v526_v44 = vadd.f32 1.0, %v1472_v42 }
 0x236   : > { %v1474_v45 = vpop.eup %1473 }
 0x237   : > { %1477 = vrcp.f32 %v526_v44  ;;  %v525_v46 = vadd.f32 1.0, %v1474_v45  ;;  %v1476_v47 = vpop.eup %1475 }
 0x238   : > { %1479 = vtanh.f32 %v499_v43 }
 0x239   : > { %1481 = vrcp.f32 %v525_v46  ;;  %v1273_v46 = vld [vmem:[%s1915_s4 + $0x58] sm:$0xff] }
 0x244   : > { %v1478_v48 = vpop.eup %1477 }
 0x245   : > { %v1480_v49 = vpop.eup %1479  ;;  %v532_v50 = vmul.f32 %v1478_v48, %v1476_v47  ;;  %v1272_v47 = vld [vmem:[%s1915_s4 + $0x50] sm:$0xff]  ;;  %v1271_v48 = vld [vmem:[%s1915_s4 + $0x48] sm:$0xff] }
 0x246   : > { %v1482_v51 = vpop.eup %1481 }
 0x247   : > { %1364 = vmatprep.subr.mxu1 %v532_v50  ;;  %v531_v52 = vmul.f32 %v1482_v51, %v1480_v49  ;;  %v1270_v49 = vld [vmem:[%s1915_s4 + $0x40] sm:$0xff]  ;;  %v1287_v51 = vld [vmem:[%s1917_s6 + $0x28] sm:$0xff] }
 0x248   : > { %1365 = vmatpush3.msra.mxu1 %v532_v50  ;;  %v1286_v50 = vld [vmem:[%s1917_s6 + $0x20] sm:$0xff] }
 0x249   : > { %1366 = vmatprep.subr.mxu1 %v531_v52 }
 0x24a   : > { %1367 = vmatpush3.msra.mxu1 %v531_v52 }
 0x24b   : > { %1369 = vmatmul.mubr.msk.f32.vlgmr.msra.gmra.mxu1 %vm547_vm5, %v534_v53 }
 0x24c   : > { %1393 = vmatprep.mubr.msk.f32.mxu1 %vm547_vm5, %v1260_v11 }
 0x30b   : > { %v1370_v55 = vpop.f32.mrf.mxu1 }
 0x30c   : > { %v1747_v57 = vadd.f32 %v1370_v55, %v545_v54 }
 0x30d   : > { %v620_v59 = vpop.f32.mrf.mxu1 }
 0x30e   : > { %v1750_v60 = vadd.f32 %v620_v59, %v540_v58  ;;  %641 = vrot.lane.b32.xlu0 %v1747_v57, %s1572_s9  ;;  %v1268_v58 = vld [vmem:[%s1914_s3 + $0x50] sm:$0xff]  ;;  %v1284_v59 = vld [vmem:[%s1916_s5 + $0x20] sm:$0xff] }
 0x310   : > { %639 = vrot.lane.b32.xlu1 %v1750_v60, %s1572_s9 }
 0x312   : > { %634 = vrot.lane.b32.xlu0 %v1747_v57, %s1573_s13 }
 0x314   : > { %632 = vrot.lane.b32.xlu1 %v1750_v60, %s1573_s13 }
 0x316   : > { %672 = vperm.xlu0 %1469, %v1249_v61  }
 0x318   : > { %667 = vperm.xlu1 %1470, %v1248_v62  }
 0x31a   : > { %662 = vperm.xlu0 %1469, %v1247_v63  }
 0x31c   : > { %657 = vperm.xlu1 %1470, %v1246_v0  }
 0x31e   : > { %801 = vperm.xlu0 %1469, %v1263_v1  }
 0x320   : > { %796 = vperm.xlu1 %1470, %v1262_v2  }
 0x380   : > { %v642_v3 = vpop.permute.xlu0 %641 }
 0x381   : > { %1371 = vmatprep.subr.msk.mxu0 %vm638_vm6, %v642_v3 }
 0x382   : > { %1372 = vmatpush3.msk.msra.mxu0 %vm638_vm6, %v642_v3  ;;  %v640_v4 = vpop.permute.xlu1 %639 }
 0x383   : > { %1373 = vmatprep.subr.msk.mxu0 %vm638_vm6, %v640_v4 }
 0x384   : > { %1374 = vmatpush3.msk.msra.mxu0 %vm638_vm6, %v640_v4  ;;  %v635_v5 = vpop.permute.xlu0 %634 }
 0x385   : > { %1375 = vmatprep.subr.mxu0 %v1747_v57 }
 0x386   : > { %1376 = vmatpush3.msra.mxu0 %v1747_v57  ;;  %v633_v6 = vpop.permute.xlu1 %632 }
 0x387   : > { %1377 = vmatprep.subr.mxu0 %v1750_v60 }
 0x388   : > { %1378 = vmatpush3.msra.mxu0 %v1750_v60 }
 0x389   : > { %1379 = vmatprep.subr.msk.mxu0 %vm631_vm7, %v635_v5 }
 0x38a   : > { %1380 = vmatpush3.msk.msra.mxu0 %vm631_vm7, %v635_v5 }
 0x38b   : > { %1381 = vmatprep.subr.msk.mxu0 %vm631_vm7, %v633_v6 }
 0x38c   : > { %1382 = vmatpush3.msk.msra.mxu0 %vm631_vm7, %v633_v6 }
 0x38d   : > { %1384 = vmatmul.mubr.msk.f32.vlgmr.msra.gmra.mxu0 %vm419_vm2, %v1243_v7 }
 0x38e   : > { %1386 = vmatprep.mubr.msk.f32.mxu0 %vm419_vm2, %v1244_v9 }
 0x391   : > { %1387 = vmatmul.mubr.msk.f32.gmra.mxu0 %vm419_vm2, %v1245_v10  ;;  %v673_v15 = vpop.permute.xlu0 %672 }
 0x392   : > { %1408 = vmatprep.mubr.msk.f32.mxu0 %vm419_vm2, %v1266_v41 }
 0x393   : > { %v668_v18 = vpop.permute.xlu1 %667 }
 0x395   : > { %v663_v24 = vpop.permute.xlu0 %662 }
 0x397   : > { %v658_v26 = vpop.permute.xlu1 %657 }
 0x399   : > { %v802_v39 = vpop.permute.xlu0 %801 }
 0x39b   : > { %v797_v43 = vpop.permute.xlu1 %796 }
 0x44d   : > { %v1385_v12 = vpop.f32.mrf.mxu0 }
 0x44e   : > { %v759_v25 = vadd.f32 %v1385_v12, %v663_v24  ;;  %v1285_v24 = vld [vmem:[%s1916_s5 + $0x28] sm:$0xff] }
 0x44f   : > { %v753_v14 = vpop.f32.mrf.mxu0 }
 0x450   : > { %v754_v28 = vadd.f32 %v753_v14, %v658_v26 }
 0x451   : > { %v1388_v16 = vpop.f32.mrf.mxu0 }
 0x452   : > { %v769_v17 = vadd.f32 %v1388_v16, %v673_v15 }
 0x453   : > { %v763_v19 = vpop.f32.mrf.mxu0 }
 0x454   : > { %v1259_v21 = vmul.f32 -1.442695, %v769_v17  ;;  %v764_v22 = vadd.f32 %v763_v19, %v668_v18 }
 0x456   : > { %1483 = vpow2.f32 %v1259_v21  ;;  %v1258_v23 = vmul.f32 -1.442695, %v764_v22 }
 0x458   : > { %1485 = vpow2.f32 %v1258_v23 }
 0x459   : > { %1487 = vtanh.f32 %v759_v25  ;;  %v630_v25 = vadd.f32 %v1747_v57, %v1686_v8 }
 0x463   : > { %v1484_v27 = vpop.eup %1483 }
 0x464   : > { %v781_v29 = vadd.f32 1.0, %v1484_v27 }
 0x465   : > { %v1486_v30 = vpop.eup %1485 }
 0x466   : > { %1489 = vrcp.f32 %v781_v29  ;;  %v780_v31 = vadd.f32 1.0, %v1486_v30  ;;  %v1488_v32 = vpop.eup %1487  ;;  %v629_v30 = vadd.f32 %v1750_v60, %v1697_v13 }
 0x467   : > { %1491 = vtanh.f32 %v754_v28 }
 0x468   : > { %1493 = vrcp.f32 %v780_v31 }
 0x473   : > { %v1490_v33 = vpop.eup %1489 }
 0x474   : > { %v1492_v34 = vpop.eup %1491  ;;  %v787_v35 = vmul.f32 %v1490_v33, %v1488_v32 }
 0x475   : > { %v1494_v36 = vpop.eup %1493 }
 0x476   : > { %1389 = vmatprep.subr.mxu1 %v787_v35  ;;  %v786_v37 = vmul.f32 %v1494_v36, %v1492_v34 }
 0x477   : > { %1390 = vmatpush3.msra.mxu1 %v787_v35 }
 0x478   : > { %1391 = vmatprep.subr.mxu1 %v786_v37 }
 0x479   : > { %1392 = vmatpush3.msra.mxu1 %v786_v37 }
 0x47a   : > { %1394 = vmatmul.mubr.msk.f32.vlgmr.msra.gmra.mxu1 %vm547_vm5, %v1261_v38 }
 0x47b   : > { %1418 = vmatprep.mubr.msk.f32.mxu1 %vm547_vm5, %v1284_v59 }
 0x53a   : > { %v1395_v40 = vpop.f32.mrf.mxu1 }
 0x53b   : > { %v1803_v42 = vadd.f32 %v1395_v40, %v802_v39 }
 0x53c   : > { %v876_v44 = vpop.f32.mrf.mxu1 }
 0x53d   : > { %v1806_v45 = vadd.f32 %v876_v44, %v797_v43  ;;  %897 = vrot.lane.b32.xlu0 %v1803_v42, %s1574_s29  ;;  %v886_v28 = vadd.f32 %v1803_v42, %v630_v25 }
 0x53f   : > { %895 = vrot.lane.b32.xlu1 %v1806_v45, %s1574_s29  ;;  %s1295_s29 = sshll.u32 %s1640_s28, 8  ;;  %v885_v34 = vadd.f32 %v1806_v45, %v629_v30  ;;  %s1871_s28 = scalar_lea.sflag [#allocation3], %s267_s20 }
 0x540   : > { %s1869_s13 = scalar_lea.hbm %s1918_s7, %s1295_s29 }
 0x541   : > { %890 = vrot.lane.b32.xlu0 %v1803_v42, %s1575_s8 }
 0x543   : > { %888 = vrot.lane.b32.xlu1 %v1806_v45, %s1575_s8 }
 0x545   : > { %928 = vperm.xlu0 %1469, %v1273_v46  }
 0x547   : > { %923 = vperm.xlu1 %1470, %v1272_v47  }
 0x549   : > { %918 = vperm.xlu0 %1469, %v1271_v48  }
 0x54b   : > { %913 = vperm.xlu1 %1470, %v1270_v49  }
 0x54d   : > { %1052 = vperm.xlu0 %1469, %v1286_v50  }
 0x54f   : > { %1057 = vperm.xlu1 %1470, %v1287_v51  }
 0x5af   : > { %v898_v52 = vpop.permute.xlu0 %897 }
 0x5b0   : > { %1396 = vmatprep.subr.msk.mxu0 %vm894_vm8, %v898_v52 }
 0x5b1   : > { %1397 = vmatpush3.msk.msra.mxu0 %vm894_vm8, %v898_v52  ;;  %v896_v53 = vpop.permute.xlu1 %895 }
 0x5b2   : > { %1398 = vmatprep.subr.msk.mxu0 %vm894_vm8, %v896_v53 }
 0x5b3   : > { %1399 = vmatpush3.msk.msra.mxu0 %vm894_vm8, %v896_v53  ;;  %v891_v54 = vpop.permute.xlu0 %890 }
 0x5b4   : > { %1400 = vmatprep.subr.mxu0 %v1803_v42 }
 0x5b5   : > { %1401 = vmatpush3.msra.mxu0 %v1803_v42  ;;  %v889_v55 = vpop.permute.xlu1 %888 }
 0x5b6   : > { %1402 = vmatprep.subr.mxu0 %v1806_v45 }
 0x5b7   : > { %1403 = vmatpush3.msra.mxu0 %v1806_v45 }
 0x5b8   : > { %1404 = vmatprep.subr.msk.mxu0 %vm887_vm9, %v891_v54 }
 0x5b9   : > { %1405 = vmatpush3.msk.msra.mxu0 %vm887_vm9, %v891_v54 }
 0x5ba   : > { %1406 = vmatprep.subr.msk.mxu0 %vm887_vm9, %v889_v55 }
 0x5bb   : > { %1407 = vmatpush3.msk.msra.mxu0 %vm887_vm9, %v889_v55 }
 0x5bc   : > { %1409 = vmatmul.mubr.msk.f32.vlgmr.msra.gmra.mxu0 %vm419_vm2, %v1267_v56 }
 0x5bd   : > { %1411 = vmatprep.mubr.msk.f32.mxu0 %vm419_vm2, %v1268_v58 }
 0x5c0   : > { %1412 = vmatmul.mubr.msk.f32.gmra.mxu0 %vm419_vm2, %v1269_v20  ;;  %v929_v63 = vpop.permute.xlu0 %928 }
 0x5c2   : > { %v924_v2 = vpop.permute.xlu1 %923 }
 0x5c4   : > { %v919_v7 = vpop.permute.xlu0 %918 }
 0x5c6   : > { %v914_v10 = vpop.permute.xlu1 %913 }
 0x5c8   : > { %v1053_v31 = vpop.permute.xlu0 %1052 }
 0x5ca   : > { %v1058_v26 = vpop.permute.xlu1 %1057 }
 0x67c   : > { %v1410_v61 = vpop.f32.mrf.mxu0 }
 0x67d   : > { %v1015_v9 = vadd.f32 %v1410_v61, %v919_v7 }
 0x67e   : > { %v1009_v62 = vpop.f32.mrf.mxu0 }
 0x67f   : > { %v1010_v12 = vadd.f32 %v1009_v62, %v914_v10 }
 0x680   : > { %v1413_v0 = vpop.f32.mrf.mxu0 }
 0x681   : > { %v1025_v1 = vadd.f32 %v1413_v0, %v929_v63 }
 0x682   : > { %v1019_v3 = vpop.f32.mrf.mxu0 }
 0x683   : > { %v1283_v4 = vmul.f32 -1.442695, %v1025_v1  ;;  %v1020_v5 = vadd.f32 %v1019_v3, %v924_v2 }
 0x685   : > { %1495 = vpow2.f32 %v1283_v4  ;;  %v1282_v6 = vmul.f32 -1.442695, %v1020_v5 }
 0x687   : > { %1497 = vpow2.f32 %v1282_v6 }
 0x688   : > { %1499 = vtanh.f32 %v1015_v9 }
 0x692   : > { %v1496_v11 = vpop.eup %1495 }
 0x693   : > { %v1037_v14 = vadd.f32 1.0, %v1496_v11 }
 0x694   : > { %v1498_v15 = vpop.eup %1497 }
 0x695   : > { %1501 = vrcp.f32 %v1037_v14  ;;  %v1036_v16 = vadd.f32 1.0, %v1498_v15  ;;  %v1500_v17 = vpop.eup %1499 }
 0x696   : > { %1503 = vtanh.f32 %v1010_v12 }
 0x697   : > { %1505 = vrcp.f32 %v1036_v16 }
 0x6a2   : > { %v1502_v18 = vpop.eup %1501 }
 0x6a3   : > { %v1504_v19 = vpop.eup %1503  ;;  %v1043_v21 = vmul.f32 %v1502_v18, %v1500_v17 }
 0x6a4   : > { %v1506_v22 = vpop.eup %1505 }
 0x6a5   : > { %1414 = vmatprep.subr.mxu1 %v1043_v21  ;;  %v1042_v23 = vmul.f32 %v1506_v22, %v1504_v19 }
 0x6a6   : > { %1415 = vmatpush3.msra.mxu1 %v1043_v21 }
 0x6a7   : > { %1416 = vmatprep.subr.mxu1 %v1042_v23 }
 0x6a8   : > { %1417 = vmatpush3.msra.mxu1 %v1042_v23 }
 0x6a9   : > { %1419 = vmatmul.mubr.msk.f32.vlgmr.msra.gmra.mxu1 %vm547_vm5, %v1285_v24 }
 0x769   : > { %v1420_v27 = vpop.f32.mrf.mxu1 }
 0x76a   : > { %v1138_v29 = vadd.f32 %v1420_v27, %v1058_v26 }
 0x76b   : > { %v1132_v32 = vpop.f32.mrf.mxu1 }
 0x76c   : > { %v1142_v33 = vadd.f32 %v1138_v29, %v886_v28  ;;  %v1133_v35 = vadd.f32 %v1132_v32, %v1053_v31 }
 0x76e   : > { %1144 = vst [vmem:[%s269_s22 + $0x8] sm:$0xff] %v1142_v33  ;;  %v1141_v8 = vadd.f32 %v1133_v35, %v885_v34 }
 0x770   : > { %1143 = vst [vmem:[%s269_s22] sm:$0xff] %v1141_v8 }
 0x771   : > { %1520 = shalt.err (!%p1517_p3)
}
 0x772   : > { %s1521_s18 = scalar_lea.hbm %s1869_s13, 256  ;;  %s1525_s21 = scalar_lea.hbm %s1918_s7, 512 }
 0x773   : > { %p1522_p4 = scmp.ne.s32.totalorder %s1869_s13, %s1521_s18  ;;  %p1526_p9 = scmp.lt.s32.totalorder %s1869_s13, %s1918_s7 }
 0x774   : > { %p1527_p10 = scmp.lt.s32.totalorder %s1525_s21, %s1521_s18 }
 0x775   : > { %p1523_p7 = pnand %p1522_p4, %p1657_p5 }
 0x776   : > { %p1528_p11 = por %p1527_p10, %p1526_p9 }
 0x777   : > { %p1524_p8 = pneg %p1523_p7 }
 0x779   : > { %p1529_p12 = pnand %p1528_p11, %p1524_p8 }
 0x77b   : > { %1532 = shalt.err (!%p1529_p12)
}
 0x77c   : > { %s1577_s8 = smov 128   ;;  %s1578_s9 = smov 8  }
 0x77d   : > { %1421 = dma.vmem_to_hbm [thread:$0]  (%p1657_p5), %s1864_s23, 256, %s1869_s13, %s1871_s28, %s1577_s8, %s1577_s8, %s1578_s9  }
 0x77e PF: > { %p1427_p13 = scmp.ge.s32.totalorder %s1567_s27, 2  ;;  %s1174_s14 = sand.u32 1, %s1555_s24  }
 0x77f   : > { %s1175_s15 = scalar_lea.sflag [#allocation3], %s1174_s14 }
 0x780   : > { %p1424_p0 = pnand %p1427_p13, %p1661_p6 }
 0x782   : > { %p1425_p1 = pneg %p1424_p0 }
 0x784   : > { %1550 = dma.done.wait (%p1425_p1), %s1175_s15, 256  }
 0x785   : > { %1552 = vsyncadd (%p1425_p1), %s1175_s15, 4294967040  ;;  %p17_p2 = scmp.ge.s32.totalorder %s1644_s30, 4   ;;  %s1921_s24 = smov %s1559_s25 }
 0x786   : > { %s1922_s25 = smov %s1563_s26  ;;  %s1923_s26 = smov %s1655_s10 }
 0x787   : > { %s1924_s27 = smov %s1644_s30  ;;  %19 = sbr.rel (!%p17_p2) target bundleno = 3 (0x3), region = 91 }
 0x78c   :  { %1180 = vsyncpa [#allocation3], 1 }
 0x78d   :  { %1182 = vsyncpa [#allocation3 + $0x1], 1 }

</bundles_post_ra>
